<compile_context>
chip_gen: v7x
topology: tpu7x:2x2x1
jax: 0.10.0
libtpu: 0.0.40
codegen_flags: <defaults>
</compile_context>

<pallas_src>
import functools

import jax
import jax.numpy as jnp
from jax.experimental import pallas as pl
from jax.experimental.pallas import tpu as pltpu


def _dynamic_relu_kernel(x_ref, o_ref, *, a):
    # x_ref / o_ref: (TM, LANES) VMEM tiles.  `a` is a compile-time python float.
    x = x_ref[...]
    av = jnp.asarray(a, dtype=x.dtype)          # match input dtype (bf16-safe)
    o_ref[...] = jnp.maximum(av * x, x).astype(o_ref.dtype)


def dynamic_relu(x, current_epoch, total_epochs, *, lanes=512, rows_per_tile=1024):
    """Pallas implementation of DynamicReLU.forward.

    x: jnp array (any shape, float dtype); current_epoch/total_epochs: python ints.
    """
    if total_epochs <= 0:
        raise ValueError("total_epochs must be > 0")
    if lanes % 128 != 0:
        raise ValueError("lanes must be a multiple of 128")
    if rows_per_tile % 8 != 0:
        raise ValueError("rows_per_tile must be a multiple of 8")

    # update_epoch clamps: min(epoch, total_epochs)
    cur = min(current_epoch, total_epochs)
    a = float(cur) / float(total_epochs)

    orig_shape = x.shape
    orig_dtype = x.dtype
    n = x.size
    if n == 0:
        return x

    # ---- lane-dense slab layout: (rows_padded, lanes), last dim on lanes ----
    flat = x.reshape(-1)
    rows = pl.cdiv(n, lanes)
    if rows <= rows_per_tile:
        tm = rows                      # single block; full-dim block is allowed
        rows_padded = rows
    else:
        tm = rows_per_tile             # multiple of 8 -> valid sublane tiling
        rows_padded = pl.cdiv(rows, tm) * tm

    n_padded = rows_padded * lanes
    if n_padded != n:
        flat = jnp.pad(flat, (0, n_padded - n))
    x2 = flat.reshape(rows_padded, lanes)

    grid = (rows_padded // tm,)
    kernel = functools.partial(_dynamic_relu_kernel, a=a)

    out2 = pl.pallas_call(
        kernel,
        out_shape=jax.ShapeDtypeStruct(x2.shape, orig_dtype),
        grid=grid,
        in_specs=[pl.BlockSpec((tm, lanes), lambda i: (i, 0))],
        out_specs=pl.BlockSpec((tm, lanes), lambda i: (i, 0)),
        compiler_params=pltpu.CompilerParams(
            dimension_semantics=("parallel",),   # shard rows across TCs on v7x
        ),
    )(x2)

    out_flat = out2.reshape(-1)
    if n_padded != n:
        out_flat = out_flat[:n]
    return out_flat.reshape(orig_shape)


if __name__ == "__main__":
    key = jax.random.PRNGKey(0)
    total_epochs = 10
    current_epoch = 3  # a = 0.3
    a = min(current_epoch, total_epochs) / total_epochs

    # --- test 1: f32, NCHW, single-tile path (with tail padding) ---
    x = jax.random.normal(key, (2, 4, 16, 16), dtype=jnp.float32)
    out = jax.block_until_ready(dynamic_relu(x, current_epoch, total_epochs))
    ref = jnp.maximum(jnp.float32(a) * x, x)
    assert out.shape == x.shape and out.dtype == x.dtype
    assert jnp.allclose(out, ref, atol=1e-6), "f32 mismatch vs reference"

    # --- test 2: small shape but forced multi-tile grid (exercises pipelining path) ---
    out2 = jax.block_until_ready(
        dynamic_relu(x, current_epoch, total_epochs, lanes=128, rows_per_tile=8)
    )
    assert jnp.allclose(out2, ref, atol=1e-6), "multi-tile mismatch vs reference"

    # --- test 3: bf16 dtype handling ---
    xb = x.astype(jnp.bfloat16)
    outb = jax.block_until_ready(dynamic_relu(xb, current_epoch, total_epochs))
    refb = jnp.maximum(jnp.bfloat16(a) * xb, xb)
    assert outb.dtype == jnp.bfloat16
    assert jnp.allclose(outb.astype(jnp.float32), refb.astype(jnp.float32),
                        atol=1e-2), "bf16 mismatch vs reference"

    print("KERNEL_OK")
</pallas_src>

<mosaic_0001>
module attributes {stable_mosaic.version = 11 : i64} {
  func.func @_dynamic_relu_kernel(%arg0: i32, %arg1: memref<4x512xf32, #tpu.memory_space<vmem>>, %arg2: memref<4x512xf32, #tpu.memory_space<vmem>>) attributes {dimension_semantics = [#tpu.dimension_semantics<parallel>], iteration_bounds = array<i64: 1>, scalar_prefetch = 0 : i64, scratch_operands = 0 : i64, tpu.core_type = #tpu.core_type<tc>, window_params = [{transform_indices = @transform_0, window_bounds = array<i64: 4, 512>}, {transform_indices = @transform_1, window_bounds = array<i64: 4, 512>}]} {
    %c0 = arith.constant 0 : index
    %c0_0 = arith.constant 0 : index
    %0 = vector.load %arg1[%c0, %c0_0] : memref<4x512xf32, #tpu.memory_space<vmem>>, vector<4x512xf32>
    %cst = arith.constant 3.000000e-01 : f32
    %1 = vector.broadcast %cst : f32 to vector<4x512xf32>
    %2 = arith.mulf %1, %0 : vector<4x512xf32>
    %3 = arith.maximumf %2, %0 : vector<4x512xf32>
    %c0_1 = arith.constant 0 : index
    %c0_2 = arith.constant 0 : index
    %4 = vector.load %arg2[%c0_1, %c0_2] : memref<4x512xf32, #tpu.memory_space<vmem>>, vector<4x512xf32>
    tpu.vector_store %arg2[%c0_1, %c0_2], %3 {strides = array<i32>} : memref<4x512xf32, #tpu.memory_space<vmem>>, vector<4x512xf32>,
    return
  }
  func.func @transform_0(%arg0: i32) -> (i32, i32) {
    %c0_i32 = arith.constant 0 : i32
    %c0_i32_0 = arith.constant 0 : i32
    return %arg0, %c0_i32 : i32, i32
  }
  func.func @transform_1(%arg0: i32) -> (i32, i32) {
    %c0_i32 = arith.constant 0 : i32
    %c0_i32_0 = arith.constant 0 : i32
    return %arg0, %c0_i32 : i32, i32
  }
}

</mosaic_0001>

<bundles_post_ra>
// kernel: tpu_custom_call.1
= control target key start
LH: loop header
LB: loop body
LE: loop exit
PB: predicated region body
PF: predicated region fallthrough
CT: control target
= control target key end

     0   :  { %6 = vsyncpa [#allocation3], 0  ;;  %s130_s0 = inlined_call_operand.hbm [shape: f32[4,512], index: 0, kind: input, shape index: {}]   ;;  %s131_s1 = inlined_call_operand.hbm [shape: f32[4,512], index: 1, kind: output, shape index: {}]  }
   0x1   :  { %7 = vsyncpa [#allocation4], 0  ;;  %s94_s6 = smov [#allocation2]   ;;  %s46_s10 = scalar_lea.hbm %s130_s0, 256 }
   0x2   :  { %s14_s7 = sshll.u32 %s94_s6, 4  ;;  %p47_p0 = scmp.ne.s32.totalorder %s130_s0, %s46_s10  ;;  %s15_s7 = int_to_ptr.vmem [resolvable:$true] %s14_s7 }
   0x3   :  { %p50_p1 = scmp.lt.u32.totalorder %s46_s10, %s130_s0 }
   0x5   :  { %p52_p2 = pnand %p50_p1, %p47_p0 }
   0x7   :  { %55 = shalt.err (!%p52_p2)
}
   0x8   :  { %s56_s15 = scalar_lea.vmem %s15_s7, 256  ;;  %p61_p4 = scmp.lt.s32.totalorder %s15_s7, %s15_s7 }
   0x9   :  { %p57_p3 = scmp.ne.s32.totalorder %s15_s7, %s56_s15  ;;  %p62_p5 = scmp.lt.s32.totalorder %s56_s15, %s56_s15 }
   0xb   :  { %p63_p6 = por %p62_p5, %p61_p4 }
   0xd   :  { %p64_p7 = pnand %p63_p6, %p57_p3 }
   0xf   :  { %67 = shalt.err (!%p64_p7)
}
  0x10   :  { %17 = dma.hbm_to_vmem [thread:$0]  %s130_s0, 256, %s15_s7, [#allocation3]  }
  0x11   :  { %90 = dma.done.wait [#allocation3], 256  }
  0x12   :  { %91 = vsyncadd [#allocation3], 4294967040  ;;  %v21_v0 = vld [vmem:[#allocation2] sm:$0xff]  ;;  %v22_v1 = vld [vmem:[#allocation2 + $0x8] sm:$0xff]  ;;  %s95_s18 = smov [#allocation5]  }
  0x13   :  { %s35_s19 = sshll.u32 %s95_s18, 4  ;;  %v23_v2 = vmul.f32 0.3, %v21_v0  ;;  %v24_v3 = vmul.f32 0.3, %v22_v1  ;;  %s36_s19 = int_to_ptr.vmem [resolvable:$true] %s35_s19 }
  0x14   :  { %s68_s20 = scalar_lea.vmem %s36_s19, 256  ;;  %p73_p9 = scmp.lt.s32.totalorder %s36_s19, %s36_s19 }
  0x15   :  { %v25_v4 = vmax.f32 %v23_v2, %v21_v0  ;;  %v26_v5 = vmax.f32 %v24_v3, %v22_v1  ;;  %p69_p8 = scmp.ne.s32.totalorder %s36_s19, %s68_s20  ;;  %p74_p10 = scmp.lt.s32.totalorder %s68_s20, %s68_s20 }
  0x17   :  { %27 = vst [vmem:[#allocation5] sm:$0xff] %v25_v4  ;;  %28 = vst [vmem:[#allocation5 + $0x8] sm:$0xff] %v26_v5  ;;  %p75_p11 = por %p74_p10, %p73_p9 }
  0x19   :  { %p76_p12 = pnand %p75_p11, %p69_p8 }
  0x1b   :  { %79 = shalt.err (!%p76_p12)
}
  0x1c   :  { %s80_s22 = scalar_lea.hbm %s131_s1, 256 }
  0x1d   :  { %p81_p13 = scmp.ne.s32.totalorder %s131_s1, %s80_s22  ;;  %p84_p0 = scmp.lt.u32.totalorder %s80_s22, %s131_s1 }
  0x1f   :  { %p86_p1 = pnand %p84_p0, %p81_p13 }
  0x21   :  { %89 = shalt.err (!%p86_p1)
}
  0x22   :  { %38 = dma.vmem_to_hbm [thread:$0]  %s36_s19, 256, %s131_s1, [#allocation4]  }
  0x23   :  { %92 = dma.done.wait [#allocation4], 256  }
  0x24   :  { %93 = vsyncadd [#allocation4], 4294967040 }
  0x25   :  { %42 = vsyncpa [#allocation3], 1 }
  0x26   :  { %43 = vsyncpa [#allocation4], 1 }

</bundles_post_ra>
